<compile_context>
chip_gen: v7x
topology: tpu7x:2x2x1
jax: 0.10.0
libtpu: 0.0.40
codegen_flags: <defaults>
</compile_context>

<pallas_src>
import jax
import jax.numpy as jnp
import numpy as np
from jax.experimental import pallas as pl
from jax.experimental.pallas import tpu as pltpu


# ----------------------------- Pallas kernel -------------------------------

def make_fused_kernel(T, B, H):
    """Fused BiLSTM + time-sum + MLP classifier kernel (grid-less)."""

    def kernel(x2_ref,                       # [T*B, 2E]  (fwd | time-reversed) embed
               w_in_ref, bias_ref,           # [2E, 8H], [1, 8H]
               w_rec_ref,                    # [2H, 8H]  block-diagonal recurrent weight
               w1_ref, b1_ref,               # [2H, 192], [1, 192]
               w2_ref, b2_ref,               # [192, 84], [1, 84]
               w3_ref, b3_ref,               # [84, C],  [1, C]
               out_ref):                     # [B, C]
        # ---- hoisted input projection (one big matmul, bias folded in) ----
        proj = (jnp.dot(x2_ref[...], w_in_ref[...],
                        preferred_element_type=jnp.float32)
                + bias_ref[...])                       # [T*B, 8H]

        w_rec = w_rec_ref[...]                         # resident through the loop

        h = jnp.zeros((B, 2 * H), jnp.float32)         # [h_fwd | h_bwd]
        c = jnp.zeros((B, 2 * H), jnp.float32)         # [c_fwd | c_bwd]
        s = jnp.zeros((B, 2 * H), jnp.float32)         # running sum over time

        # ---- recurrence: fully unrolled static loop, one MXU op per step ----
        for t in range(T):
            gin = proj[t * B:(t + 1) * B, :]           # [B, 8H], static slice
            gates = gin + jnp.dot(h, w_rec,
                                  preferred_element_type=jnp.float32)
            # column layout: (i_f, i_b, f_f, f_b, o_f, o_b, g_f, g_b)
            sig = jax.nn.sigmoid(gates[:, :6 * H])     # i,f,o for both dirs
            g = jnp.tanh(gates[:, 6 * H:])             # g for both dirs
            i = sig[:, 0:2 * H]
            f = sig[:, 2 * H:4 * H]
            o = sig[:, 4 * H:6 * H]
            c = f * c + i * g
            h = o * jnp.tanh(c)
            s = s + h

        # ---- classifier epilogue (Linear -> ReLU -> Linear -> ReLU -> Linear) ----
        h1 = jnp.maximum(
            jnp.dot(s, w1_ref[...], preferred_element_type=jnp.float32)
            + b1_ref[...], 0.0)
        h2 = jnp.maximum(
            jnp.dot(h1, w2_ref[...], preferred_element_type=jnp.float32)
            + b2_ref[...], 0.0)
        out_ref[...] = (
            jnp.dot(h2, w3_ref[...], preferred_element_type=jnp.float32)
            + b3_ref[...])

    return kernel


# --------------------- host-side parameter packing --------------------------

def _split_gates_ifog(m, H):
    """PyTorch gate order (i, f, g, o) along last dim -> returns (i, f, o, g)."""
    return (m[..., 0:H], m[..., H:2 * H], m[..., 3 * H:4 * H], m[..., 2 * H:3 * H])


def pack_params(p):
    """Pack PyTorch-layout params into the fused kernel layout (done once, host-side)."""
    H = p["w_hh_f"].shape[1]
    E = p["w_ih_f"].shape[1]
    f32 = jnp.float32

    # --- input-projection weight [2E, 8H]: rows 0:E = fwd embed, E:2E = bwd embed
    wi_f = p["w_ih_f"].T.astype(f32)   # [E, 4H]
    wi_b = p["w_ih_b"].T.astype(f32)
    i_f, f_f, o_f, g_f = _split_gates_ifog(wi_f, H)
    i_b, f_b, o_b, g_b = _split_gates_ifog(wi_b, H)
    Ze = jnp.zeros((E, H), f32)
    w_in = jnp.concatenate([
        jnp.concatenate([i_f, Ze, f_f, Ze, o_f, Ze, g_f, Ze], axis=1),
        jnp.concatenate([Ze, i_b, Ze, f_b, Ze, o_b, Ze, g_b], axis=1)], axis=0)

    # --- recurrent block-diagonal weight [2H, 8H]: rows 0:H = h_fwd, H:2H = h_bwd
    wh_f = p["w_hh_f"].T.astype(f32)   # [H, 4H]
    wh_b = p["w_hh_b"].T.astype(f32)
    i_f, f_f, o_f, g_f = _split_gates_ifog(wh_f, H)
    i_b, f_b, o_b, g_b = _split_gates_ifog(wh_b, H)
    Zh = jnp.zeros((H, H), f32)
    w_rec = jnp.concatenate([
        jnp.concatenate([i_f, Zh, f_f, Zh, o_f, Zh, g_f, Zh], axis=1),
        jnp.concatenate([Zh, i_b, Zh, f_b, Zh, o_b, Zh, g_b], axis=1)], axis=0)

    # --- combined bias (b_ih + b_hh) in fused column layout, [1, 8H]
    bf = (p["b_ih_f"] + p["b_hh_f"]).astype(f32)
    bb = (p["b_ih_b"] + p["b_hh_b"]).astype(f32)
    i_f, f_f, o_f, g_f = _split_gates_ifog(bf, H)
    i_b, f_b, o_b, g_b = _split_gates_ifog(bb, H)
    bias = jnp.concatenate([i_f, i_b, f_f, f_b, o_f, o_b, g_f, g_b])[None, :]

    return {
        "embedding": p["embedding"].astype(f32),
        "w_in": w_in, "w_rec": w_rec, "bias": bias,
        "w1": p["fc1_w"].T.astype(f32), "b1": p["fc1_b"].astype(f32)[None, :],
        "w2": p["fc2_w"].T.astype(f32), "b2": p["fc2_b"].astype(f32)[None, :],
        "w3": p["fc3_w"].T.astype(f32), "b3": p["fc3_b"].astype(f32)[None, :],
    }


# ------------------------------ JAX wrapper ---------------------------------

def bilstm_sum_net(x_tokens, packed):
    """x_tokens: [T, B] int32 token ids (seq-first, PyTorch nn.LSTM default)."""
    T, B = x_tokens.shape
    E = packed["embedding"].shape[1]
    H = packed["w_rec"].shape[0] // 2
    C = packed["w3"].shape[1]

    table = packed["embedding"]
    # doubled embedding: first E cols = embed at time t, last E = embed at T-1-t
    emb2 = jnp.concatenate([table[x_tokens], table[x_tokens[::-1]]], axis=-1)
    x2 = emb2.reshape(T * B, 2 * E)

    vmem = pl.BlockSpec(memory_space=pltpu.MemorySpace.VMEM)
    logits = pl.pallas_call(
        make_fused_kernel(T, B, H),
        out_shape=jax.ShapeDtypeStruct((B, C), jnp.float32),
        in_specs=[vmem] * 10,
        out_specs=vmem,
    )(x2,
      packed["w_in"], packed["bias"], packed["w_rec"],
      packed["w1"], packed["b1"],
      packed["w2"], packed["b2"],
      packed["w3"], packed["b3"])
    return logits


# --------------------------- pure-JAX reference ------------------------------

def reference_forward(x_tokens, p):
    """Faithful reimplementation of the PyTorch module semantics."""
    H = p["w_hh_f"].shape[1]
    emb = p["embedding"][x_tokens]                     # [T, B, E]
    B = emb.shape[1]

    def run(seq, w_ih, w_hh, b_ih, b_hh):
        wi, wh, b = w_ih.T, w_hh.T, b_ih + b_hh

        def cell(carry, x):
            h, c = carry
            gates = x @ wi + h @ wh + b
            i = jax.nn.sigmoid(gates[:, 0:H])
            f = jax.nn.sigmoid(gates[:, H:2 * H])
            g = jnp.tanh(gates[:, 2 * H:3 * H])
            o = jax.nn.sigmoid(gates[:, 3 * H:4 * H])
            c = f * c + i * g
            h = o * jnp.tanh(c)
            return (h, c), h

        init = (jnp.zeros((B, H)), jnp.zeros((B, H)))
        _, hs = jax.lax.scan(cell, init, seq)
        return hs                                      # [T, B, H]

    hs_f = run(emb, p["w_ih_f"], p["w_hh_f"], p["b_ih_f"], p["b_hh_f"])
    hs_b = run(emb[::-1], p["w_ih_b"], p["w_hh_b"], p["b_ih_b"], p["b_hh_b"])[::-1]
    out = jnp.concatenate([hs_f, hs_b], axis=-1)       # [T, B, 2H]
    summed = jnp.sum(out, axis=0)                      # [B, 2H]  (= transpose+sum)
    h1 = jnp.maximum(summed @ p["fc1_w"].T + p["fc1_b"], 0.0)
    h2 = jnp.maximum(h1 @ p["fc2_w"].T + p["fc2_b"], 0.0)
    return h2 @ p["fc3_w"].T + p["fc3_b"]


# --------------------------------- main --------------------------------------

if __name__ == "__main__":
    T, B = 8, 2
    vocab_size, embed_size, hidden_size, class_num = 50, 32, 32, 5
    E, H, C = embed_size, hidden_size, class_num

    key = jax.random.PRNGKey(0)
    keys = jax.random.split(key, 20)

    def init(k, shape, scale=0.1):
        return (scale * jax.random.normal(k, shape)).astype(jnp.float32)

    # canonical PyTorch-layout parameters (gate order i, f, g, o; weights [out, in])
    params = {
        "embedding": init(keys[0], (vocab_size, E), 1.0),
        "w_ih_f": init(keys[1], (4 * H, E)),
        "w_hh_f": init(keys[2], (4 * H, H)),
        "b_ih_f": init(keys[3], (4 * H,)),
        "b_hh_f": init(keys[4], (4 * H,)),
        "w_ih_b": init(keys[5], (4 * H, E)),
        "w_hh_b": init(keys[6], (4 * H, H)),
        "b_ih_b": init(keys[7], (4 * H,)),
        "b_hh_b": init(keys[8], (4 * H,)),
        "fc1_w": init(keys[9], (192, 2 * H)),
        "fc1_b": init(keys[10], (192,)),
        "fc2_w": init(keys[11], (84, 192)),
        "fc2_b": init(keys[12], (84,)),
        "fc3_w": init(keys[13], (C, 84)),
        "fc3_b": init(keys[14], (C,)),
    }
    packed = pack_params(params)

    x_tokens = jax.random.randint(keys[15], (T, B), 0, vocab_size, dtype=jnp.int32)

    out = jax.block_until_ready(bilstm_sum_net(x_tokens, packed))
    ref = jax.block_until_ready(reference_forward(x_tokens, params))

    assert out.shape == (B, C), out.shape
    np.testing.assert_allclose(np.asarray(out), np.asarray(ref),
                               rtol=1e-4, atol=1e-4)
    print("KERNEL_OK")
</pallas_src>

<mosaic_0001>
module attributes {stable_mosaic.version = 11 : i64} {
  func.func @kernel(%arg0: memref<16x64xf32, #tpu.memory_space<vmem>>, %arg1: memref<64x256xf32, #tpu.memory_space<vmem>>, %arg2: memref<1x256xf32, #tpu.memory_space<vmem>>, %arg3: memref<64x256xf32, #tpu.memory_space<vmem>>, %arg4: memref<64x192xf32, #tpu.memory_space<vmem>>, %arg5: memref<1x192xf32, #tpu.memory_space<vmem>>, %arg6: memref<192x84xf32, #tpu.memory_space<vmem>>, %arg7: memref<1x84xf32, #tpu.memory_space<vmem>>, %arg8: memref<84x5xf32, #tpu.memory_space<vmem>>, %arg9: memref<1x5xf32, #tpu.memory_space<vmem>>, %arg10: memref<2x5xf32, #tpu.memory_space<vmem>>) attributes {dimension_semantics = [], scalar_prefetch = 0 : i64, scratch_operands = 0 : i64, tpu.core_type = #tpu.core_type<tc>} {
    %c0 = arith.constant 0 : index
    %c0_0 = arith.constant 0 : index
    %0 = vector.load %arg0[%c0, %c0_0] : memref<16x64xf32, #tpu.memory_space<vmem>>, vector<16x64xf32>
    %c0_1 = arith.constant 0 : index
    %c0_2 = arith.constant 0 : index
    %1 = vector.load %arg1[%c0_1, %c0_2] : memref<64x256xf32, #tpu.memory_space<vmem>>, vector<64x256xf32>
    %cst = arith.constant dense<0.000000e+00> : vector<16x256xf32>
    %2 = tpu.matmul %0, %1, %cst {dimension_numbers = #tpu.dot_dimension_numbers<[1], [0], [0], [1], [0, 0, 1, 1], [], []>} : vector<16x64xf32>, vector<64x256xf32>, vector<16x256xf32> -> vector<16x256xf32>
    %c0_3 = arith.constant 0 : index
    %c0_4 = arith.constant 0 : index
    %3 = vector.load %arg2[%c0_3, %c0_4] : memref<1x256xf32, #tpu.memory_space<vmem>>, vector<1x256xf32>
    %4 = vector.broadcast %3 : vector<1x256xf32> to vector<16x256xf32>
    %5 = arith.addf %2, %4 : vector<16x256xf32>
    %c0_5 = arith.constant 0 : index
    %c0_6 = arith.constant 0 : index
    %6 = vector.load %arg3[%c0_5, %c0_6] : memref<64x256xf32, #tpu.memory_space<vmem>>, vector<64x256xf32>
    %cst_7 = arith.constant 0.000000e+00 : f32
    %7 = vector.broadcast %cst_7 : f32 to vector<2x64xf32>
    %cst_8 = arith.constant 0.000000e+00 : f32
    %8 = vector.broadcast %cst_8 : f32 to vector<2x64xf32>
    %cst_9 = arith.constant 0.000000e+00 : f32
    %9 = vector.broadcast %cst_9 : f32 to vector<2x64xf32>
    %10 = vector.extract_strided_slice %5 {offsets = [0, 0], sizes = [2, 256], strides = [1, 1]} : vector<16x256xf32> to vector<2x256xf32>
    %cst_10 = arith.constant dense<0.000000e+00> : vector<2x256xf32>
    %11 = tpu.matmul %7, %6, %cst_10 {dimension_numbers = #tpu.dot_dimension_numbers<[1], [0], [0], [1], [0, 0, 1, 1], [], []>} : vector<2x64xf32>, vector<64x256xf32>, vector<2x256xf32> -> vector<2x256xf32>
    %12 = arith.addf %10, %11 : vector<2x256xf32>
    %13 = vector.extract_strided_slice %12 {offsets = [0, 0], sizes = [2, 192], strides = [1, 1]} : vector<2x256xf32> to vector<2x192xf32>
    %14 = arith.negf %13 : vector<2x192xf32>
    %15 = math.exp %14 : vector<2x192xf32>
    %cst_11 = arith.constant 1.000000e+00 : f32
    %16 = vector.broadcast %cst_11 : f32 to vector<2x192xf32>
    %17 = arith.addf %16, %15 : vector<2x192xf32>
    %18 = arith.divf %16, %17 : vector<2x192xf32>
    %19 = vector.extract_strided_slice %12 {offsets = [0, 192], sizes = [2, 64], strides = [1, 1]} : vector<2x256xf32> to vector<2x64xf32>
    %20 = math.tanh %19 : vector<2x64xf32>
    %21 = vector.extract_strided_slice %18 {offsets = [0, 0], sizes = [2, 64], strides = [1, 1]} : vector<2x192xf32> to vector<2x64xf32>
    %22 = vector.extract_strided_slice %18 {offsets = [0, 64], sizes = [2, 64], strides = [1, 1]} : vector<2x192xf32> to vector<2x64xf32>
    %23 = vector.extract_strided_slice %18 {offsets = [0, 128], sizes = [2, 64], strides = [1, 1]} : vector<2x192xf32> to vector<2x64xf32>
    %24 = arith.mulf %22, %8 : vector<2x64xf32>
    %25 = arith.mulf %21, %20 : vector<2x64xf32>
    %26 = arith.addf %24, %25 : vector<2x64xf32>
    %27 = math.tanh %26 : vector<2x64xf32>
    %28 = arith.mulf %23, %27 : vector<2x64xf32>
    %29 = arith.addf %9, %28 : vector<2x64xf32>
    %30 = vector.extract_strided_slice %5 {offsets = [2, 0], sizes = [2, 256], strides = [1, 1]} : vector<16x256xf32> to vector<2x256xf32>
    %cst_12 = arith.constant dense<0.000000e+00> : vector<2x256xf32>
    %31 = tpu.matmul %28, %6, %cst_12 {dimension_numbers = #tpu.dot_dimension_numbers<[1], [0], [0], [1], [0, 0, 1, 1], [], []>} : vector<2x64xf32>, vector<64x256xf32>, vector<2x256xf32> -> vector<2x256xf32>
    %32 = arith.addf %30, %31 : vector<2x256xf32>
    %33 = vector.extract_strided_slice %32 {offsets = [0, 0], sizes = [2, 192], strides = [1, 1]} : vector<2x256xf32> to vector<2x192xf32>
    %34 = arith.negf %33 : vector<2x192xf32>
    %35 = math.exp %34 : vector<2x192xf32>
    %cst_13 = arith.constant 1.000000e+00 : f32
    %36 = vector.broadcast %cst_13 : f32 to vector<2x192xf32>
    %37 = arith.addf %36, %35 : vector<2x192xf32>
    %38 = arith.divf %36, %37 : vector<2x192xf32>
    %39 = vector.extract_strided_slice %32 {offsets = [0, 192], sizes = [2, 64], strides = [1, 1]} : vector<2x256xf32> to vector<2x64xf32>
    %40 = math.tanh %39 : vector<2x64xf32>
    %41 = vector.extract_strided_slice %38 {offsets = [0, 0], sizes = [2, 64], strides = [1, 1]} : vector<2x192xf32> to vector<2x64xf32>
    %42 = vector.extract_strided_slice %38 {offsets = [0, 64], sizes = [2, 64], strides = [1, 1]} : vector<2x192xf32> to vector<2x64xf32>
    %43 = vector.extract_strided_slice %38 {offsets = [0, 128], sizes = [2, 64], strides = [1, 1]} : vector<2x192xf32> to vector<2x64xf32>
    %44 = arith.mulf %42, %26 : vector<2x64xf32>
    %45 = arith.mulf %41, %40 : vector<2x64xf32>
    %46 = arith.addf %44, %45 : vector<2x64xf32>
    %47 = math.tanh %46 : vector<2x64xf32>
    %48 = arith.mulf %43, %47 : vector<2x64xf32>
    %49 = arith.addf %29, %48 : vector<2x64xf32>
    %50 = vector.extract_strided_slice %5 {offsets = [4, 0], sizes = [2, 256], strides = [1, 1]} : vector<16x256xf32> to vector<2x256xf32>
    %cst_14 = arith.constant dense<0.000000e+00> : vector<2x256xf32>
    %51 = tpu.matmul %48, %6, %cst_14 {dimension_numbers = #tpu.dot_dimension_numbers<[1], [0], [0], [1], [0, 0, 1, 1], [], []>} : vector<2x64xf32>, vector<64x256xf32>, vector<2x256xf32> -> vector<2x256xf32>
    %52 = arith.addf %50, %51 : vector<2x256xf32>
    %53 = vector.extract_strided_slice %52 {offsets = [0, 0], sizes = [2, 192], strides = [1, 1]} : vector<2x256xf32> to vector<2x192xf32>
    %54 = arith.negf %53 : vector<2x192xf32>
    %55 = math.exp %54 : vector<2x192xf32>
    %cst_15 = arith.constant 1.000000e+00 : f32
    %56 = vector.broadcast %cst_15 : f32 to vector<2x192xf32>
    %57 = arith.addf %56, %55 : vector<2x192xf32>
    %58 = arith.divf %56, %57 : vector<2x192xf32>
    %59 = vector.extract_strided_slice %52 {offsets = [0, 192], sizes = [2, 64], strides = [1, 1]} : vector<2x256xf32> to vector<2x64xf32>
    %60 = math.tanh %59 : vector<2x64xf32>
    %61 = vector.extract_strided_slice %58 {offsets = [0, 0], sizes = [2, 64], strides = [1, 1]} : vector<2x192xf32> to vector<2x64xf32>
    %62 = vector.extract_strided_slice %58 {offsets = [0, 64], sizes = [2, 64], strides = [1, 1]} : vector<2x192xf32> to vector<2x64xf32>
    %63 = vector.extract_strided_slice %58 {offsets = [0, 128], sizes = [2, 64], strides = [1, 1]} : vector<2x192xf32> to vector<2x64xf32>
    %64 = arith.mulf %62, %46 : vector<2x64xf32>
    %65 = arith.mulf %61, %60 : vector<2x64xf32>
    %66 = arith.addf %64, %65 : vector<2x64xf32>
    %67 = math.tanh %66 : vector<2x64xf32>
    %68 = arith.mulf %63, %67 : vector<2x64xf32>
    %69 = arith.addf %49, %68 : vector<2x64xf32>
    %70 = vector.extract_strided_slice %5 {offsets = [6, 0], sizes = [2, 256], strides = [1, 1]} : vector<16x256xf32> to vector<2x256xf32>
    %cst_16 = arith.constant dense<0.000000e+00> : vector<2x256xf32>
    %71 = tpu.matmul %68, %6, %cst_16 {dimension_numbers = #tpu.dot_dimension_numbers<[1], [0], [0], [1], [0, 0, 1, 1], [], []>} : vector<2x64xf32>, vector<64x256xf32>, vector<2x256xf32> -> vector<2x256xf32>
    %72 = arith.addf %70, %71 : vector<2x256xf32>
    %73 = vector.extract_strided_slice %72 {offsets = [0, 0], sizes = [2, 192], strides = [1, 1]} : vector<2x256xf32> to vector<2x192xf32>
    %74 = arith.negf %73 : vector<2x192xf32>
    %75 = math.exp %74 : vector<2x192xf32>
    %cst_17 = arith.constant 1.000000e+00 : f32
    %76 = vector.broadcast %cst_17 : f32 to vector<2x192xf32>
    %77 = arith.addf %76, %75 : vector<2x192xf32>
    %78 = arith.divf %76, %77 : vector<2x192xf32>
    %79 = vector.extract_strided_slice %72 {offsets = [0, 192], sizes = [2, 64], strides = [1, 1]} : vector<2x256xf32> to vector<2x64xf32>
    %80 = math.tanh %79 : vector<2x64xf32>
    %81 = vector.extract_strided_slice %78 {offsets = [0, 0], sizes = [2, 64], strides = [1, 1]} : vector<2x192xf32> to vector<2x64xf32>
    %82 = vector.extract_strided_slice %78 {offsets = [0, 64], sizes = [2, 64], strides = [1, 1]} : vector<2x192xf32> to vector<2x64xf32>
    %83 = vector.extract_strided_slice %78 {offsets = [0, 128], sizes = [2, 64], strides = [1, 1]} : vector<2x192xf32> to vector<2x64xf32>
    %84 = arith.mulf %82, %66 : vector<2x64xf32>
    %85 = arith.mulf %81, %80 : vector<2x64xf32>
    %86 = arith.addf %84, %85 : vector<2x64xf32>
    %87 = math.tanh %86 : vector<2x64xf32>
    %88 = arith.mulf %83, %87 : vector<2x64xf32>
    %89 = arith.addf %69, %88 : vector<2x64xf32>
    %90 = vector.extract_strided_slice %5 {offsets = [8, 0], sizes = [2, 256], strides = [1, 1]} : vector<16x256xf32> to vector<2x256xf32>
    %cst_18 = arith.constant dense<0.000000e+00> : vector<2x256xf32>
    %91 = tpu.matmul %88, %6, %cst_18 {dimension_numbers = #tpu.dot_dimension_numbers<[1], [0], [0], [1], [0, 0, 1, 1], [], []>} : vector<2x64xf32>, vector<64x256xf32>, vector<2x256xf32> -> vector<2x256xf32>
    %92 = arith.addf %90, %91 : vector<2x256xf32>
    %93 = vector.extract_strided_slice %92 {offsets = [0, 0], sizes = [2, 192], strides = [1, 1]} : vector<2x256xf32> to vector<2x192xf32>
    %94 = arith.negf %93 : vector<2x192xf32>
    %95 = math.exp %94 : vector<2x192xf32>
    %cst_19 = arith.constant 1.000000e+00 : f32
    %96 = vector.broadcast %cst_19 : f32 to vector<2x192xf32>
    %97 = arith.addf %96, %95 : vector<2x192xf32>
    %98 = arith.divf %96, %97 : vector<2x192xf32>
    %99 = vector.extract_strided_slice %92 {offsets = [0, 192], sizes = [2, 64], strides = [1, 1]} : vector<2x256xf32> to vector<2x64xf32>
    %100 = math.tanh %99 : vector<2x64xf32>
    %101 = vector.extract_strided_slice %98 {offsets = [0, 0], sizes = [2, 64], strides = [1, 1]} : vector<2x192xf32> to vector<2x64xf32>
    %102 = vector.extract_strided_slice %98 {offsets = [0, 64], sizes = [2, 64], strides = [1, 1]} : vector<2x192xf32> to vector<2x64xf32>
    %103 = vector.extract_strided_slice %98 {offsets = [0, 128], sizes = [2, 64], strides = [1, 1]} : vector<2x192xf32> to vector<2x64xf32>
    %104 = arith.mulf %102, %86 : vector<2x64xf32>
    %105 = arith.mulf %101, %100 : vector<2x64xf32>
    %106 = arith.addf %104, %105 : vector<2x64xf32>
    %107 = math.tanh %106 : vector<2x64xf32>
    %108 = arith.mulf %103, %107 : vector<2x64xf32>
    %109 = arith.addf %89, %108 : vector<2x64xf32>
    %110 = vector.extract_strided_slice %5 {offsets = [10, 0], sizes = [2, 256], strides = [1, 1]} : vector<16x256xf32> to vector<2x256xf32>
    %cst_20 = arith.constant dense<0.000000e+00> : vector<2x256xf32>
    %111 = tpu.matmul %108, %6, %cst_20 {dimension_numbers = #tpu.dot_dimension_numbers<[1], [0], [0], [1], [0, 0, 1, 1], [], []>} : vector<2x64xf32>, vector<64x256xf32>, vector<2x256xf32> -> vector<2x256xf32>
    %112 = arith.addf %110, %111 : vector<2x256xf32>
    %113 = vector.extract_strided_slice %112 {offsets = [0, 0], sizes = [2, 192], strides = [1, 1]} : vector<2x256xf32> to vector<2x192xf32>
    %114 = arith.negf %113 : vector<2x192xf32>
    %115 = math.exp %114 : vector<2x192xf32>
    %cst_21 = arith.constant 1.000000e+00 : f32
    %116 = vector.broadcast %cst_21 : f32 to vector<2x192xf32>
    %117 = arith.addf %116, %115 : vector<2x192xf32>
    %118 = arith.divf %116, %117 : vector<2x192xf32>
    %119 = vector.extract_strided_slice %112 {offsets = [0, 192], sizes = [2, 64], strides = [1, 1]} : vector<2x256xf32> to vector<2x64xf32>
    %120 = math.tanh %119 : vector<2x64xf32>
    %121 = vector.extract_strided_slice %118 {offsets = [0, 0], sizes = [2, 64], strides = [1, 1]} : vector<2x192xf32> to vector<2x64xf32>
    %122 = vector.extract_strided_slice %118 {offsets = [0, 64], sizes = [2, 64], strides = [1, 1]} : vector<2x192xf32> to vector<2x64xf32>
    %123 = vector.extract_strided_slice %118 {offsets = [0, 128], sizes = [2, 64], strides = [1, 1]} : vector<2x192xf32> to vector<2x64xf32>
    %124 = arith.mulf %122, %106 : vector<2x64xf32>
    %125 = arith.mulf %121, %120 : vector<2x64xf32>
    %126 = arith.addf %124, %125 : vector<2x64xf32>
    %127 = math.tanh %126 : vector<2x64xf32>
    %128 = arith.mulf %123, %127 : vector<2x64xf32>
    %129 = arith.addf %109, %128 : vector<2x64xf32>
    %130 = vector.extract_strided_slice %5 {offsets = [12, 0], sizes = [2, 256], strides = [1, 1]} : vector<16x256xf32> to vector<2x256xf32>
    %cst_22 = arith.constant dense<0.000000e+00> : vector<2x256xf32>
    %131 = tpu.matmul %128, %6, %cst_22 {dimension_numbers = #tpu.dot_dimension_numbers<[1], [0], [0], [1], [0, 0, 1, 1], [], []>} : vector<2x64xf32>, vector<64x256xf32>, vector<2x256xf32> -> vector<2x256xf32>
    %132 = arith.addf %130, %131 : vector<2x256xf32>
    %133 = vector.extract_strided_slice %132 {offsets = [0, 0], sizes = [2, 192], strides = [1, 1]} : vector<2x256xf32> to vector<2x192xf32>
    %134 = arith.negf %133 : vector<2x192xf32>
    %135 = math.exp %134 : vector<2x192xf32>
    %cst_23 = arith.constant 1.000000e+00 : f32
    %136 = vector.broadcast %cst_23 : f32 to vector<2x192xf32>
    %137 = arith.addf %136, %135 : vector<2x192xf32>
    %138 = arith.divf %136, %137 : vector<2x192xf32>
    %139 = vector.extract_strided_slice %132 {offsets = [0, 192], sizes = [2, 64], strides = [1, 1]} : vector<2x256xf32> to vector<2x64xf32>
    %140 = math.tanh %139 : vector<2x64xf32>
    %141 = vector.extract_strided_slice %138 {offsets = [0, 0], sizes = [2, 64], strides = [1, 1]} : vector<2x192xf32> to vector<2x64xf32>
    %142 = vector.extract_strided_slice %138 {offsets = [0, 64], sizes = [2, 64], strides = [1, 1]} : vector<2x192xf32> to vector<2x64xf32>
    %143 = vector.extract_strided_slice %138 {offsets = [0, 128], sizes = [2, 64], strides = [1, 1]} : vector<2x192xf32> to vector<2x64xf32>
    %144 = arith.mulf %142, %126 : vector<2x64xf32>
    %145 = arith.mulf %141, %140 : vector<2x64xf32>
    %146 = arith.addf %144, %145 : vector<2x64xf32>
    %147 = math.tanh %146 : vector<2x64xf32>
    %148 = arith.mulf %143, %147 : vector<2x64xf32>
    %149 = arith.addf %129, %148 : vector<2x64xf32>
    %150 = vector.extract_strided_slice %5 {offsets = [14, 0], sizes = [2, 256], strides = [1, 1]} : vector<16x256xf32> to vector<2x256xf32>
    %cst_24 = arith.constant dense<0.000000e+00> : vector<2x256xf32>
    %151 = tpu.matmul %148, %6, %cst_24 {dimension_numbers = #tpu.dot_dimension_numbers<[1], [0], [0], [1], [0, 0, 1, 1], [], []>} : vector<2x64xf32>, vector<64x256xf32>, vector<2x256xf32> -> vector<2x256xf32>
    %152 = arith.addf %150, %151 : vector<2x256xf32>
    %153 = vector.extract_strided_slice %152 {offsets = [0, 0], sizes = [2, 192], strides = [1, 1]} : vector<2x256xf32> to vector<2x192xf32>
    %154 = arith.negf %153 : vector<2x192xf32>
    %155 = math.exp %154 : vector<2x192xf32>
    %cst_25 = arith.constant 1.000000e+00 : f32
    %156 = vector.broadcast %cst_25 : f32 to vector<2x192xf32>
    %157 = arith.addf %156, %155 : vector<2x192xf32>
    %158 = arith.divf %156, %157 : vector<2x192xf32>
    %159 = vector.extract_strided_slice %152 {offsets = [0, 192], sizes = [2, 64], strides = [1, 1]} : vector<2x256xf32> to vector<2x64xf32>
    %160 = math.tanh %159 : vector<2x64xf32>
    %161 = vector.extract_strided_slice %158 {offsets = [0, 0], sizes = [2, 64], strides = [1, 1]} : vector<2x192xf32> to vector<2x64xf32>
    %162 = vector.extract_strided_slice %158 {offsets = [0, 64], sizes = [2, 64], strides = [1, 1]} : vector<2x192xf32> to vector<2x64xf32>
    %163 = vector.extract_strided_slice %158 {offsets = [0, 128], sizes = [2, 64], strides = [1, 1]} : vector<2x192xf32> to vector<2x64xf32>
    %164 = arith.mulf %162, %146 : vector<2x64xf32>
    %165 = arith.mulf %161, %160 : vector<2x64xf32>
    %166 = arith.addf %164, %165 : vector<2x64xf32>
    %167 = math.tanh %166 : vector<2x64xf32>
    %168 = arith.mulf %163, %167 : vector<2x64xf32>
    %169 = arith.addf %149, %168 : vector<2x64xf32>
    %c0_26 = arith.constant 0 : index
    %c0_27 = arith.constant 0 : index
    %170 = vector.load %arg4[%c0_26, %c0_27] : memref<64x192xf32, #tpu.memory_space<vmem>>, vector<64x192xf32>
    %cst_28 = arith.constant dense<0.000000e+00> : vector<2x192xf32>
    %171 = tpu.matmul %169, %170, %cst_28 {dimension_numbers = #tpu.dot_dimension_numbers<[1], [0], [0], [1], [0, 0, 1, 1], [], []>} : vector<2x64xf32>, vector<64x192xf32>, vector<2x192xf32> -> vector<2x192xf32>
    %c0_29 = arith.constant 0 : index
    %c0_30 = arith.constant 0 : index
    %172 = vector.load %arg5[%c0_29, %c0_30] : memref<1x192xf32, #tpu.memory_space<vmem>>, vector<1x192xf32>
    %173 = vector.broadcast %172 : vector<1x192xf32> to vector<2x192xf32>
    %174 = arith.addf %171, %173 : vector<2x192xf32>
    %cst_31 = arith.constant 0.000000e+00 : f32
    %175 = vector.broadcast %cst_31 : f32 to vector<2x192xf32>
    %176 = arith.maximumf %174, %175 : vector<2x192xf32>
    %c0_32 = arith.constant 0 : index
    %c0_33 = arith.constant 0 : index
    %177 = vector.load %arg6[%c0_32, %c0_33] : memref<192x84xf32, #tpu.memory_space<vmem>>, vector<192x84xf32>
    %cst_34 = arith.constant dense<0.000000e+00> : vector<2x84xf32>
    %178 = tpu.matmul %176, %177, %cst_34 {dimension_numbers = #tpu.dot_dimension_numbers<[1], [0], [0], [1], [0, 0, 1, 1], [], []>} : vector<2x192xf32>, vector<192x84xf32>, vector<2x84xf32> -> vector<2x84xf32>
    %c0_35 = arith.constant 0 : index
    %c0_36 = arith.constant 0 : index
    %179 = vector.load %arg7[%c0_35, %c0_36] : memref<1x84xf32, #tpu.memory_space<vmem>>, vector<1x84xf32>
    %180 = vector.broadcast %179 : vector<1x84xf32> to vector<2x84xf32>
    %181 = arith.addf %178, %180 : vector<2x84xf32>
    %cst_37 = arith.constant 0.000000e+00 : f32
    %182 = vector.broadcast %cst_37 : f32 to vector<2x84xf32>
    %183 = arith.maximumf %181, %182 : vector<2x84xf32>
    %c0_38 = arith.constant 0 : index
    %c0_39 = arith.constant 0 : index
    %184 = vector.load %arg8[%c0_38, %c0_39] : memref<84x5xf32, #tpu.memory_space<vmem>>, vector<84x5xf32>
    %cst_40 = arith.constant dense<0.000000e+00> : vector<2x5xf32>
    %185 = tpu.matmul %183, %184, %cst_40 {dimension_numbers = #tpu.dot_dimension_numbers<[1], [0], [0], [1], [0, 0, 1, 1], [], []>} : vector<2x84xf32>, vector<84x5xf32>, vector<2x5xf32> -> vector<2x5xf32>
    %c0_41 = arith.constant 0 : index
    %c0_42 = arith.constant 0 : index
    %186 = vector.load %arg9[%c0_41, %c0_42] : memref<1x5xf32, #tpu.memory_space<vmem>>, vector<1x5xf32>
    %187 = vector.broadcast %186 : vector<1x5xf32> to vector<2x5xf32>
    %188 = arith.addf %185, %187 : vector<2x5xf32>
    %c0_43 = arith.constant 0 : index
    %c0_44 = arith.constant 0 : index
    %189 = vector.load %arg10[%c0_43, %c0_44] : memref<2x5xf32, #tpu.memory_space<vmem>>, vector<2x5xf32>
    tpu.vector_store %arg10[%c0_43, %c0_44], %188 {strides = array<i32>} : memref<2x5xf32, #tpu.memory_space<vmem>>, vector<2x5xf32>,
    return
  }
}

</mosaic_0001>

<bundles_post_ra>
// kernel: tpu_custom_call.1
= control target key start
LH: loop header
LB: loop body
LE: loop exit
PB: predicated region body
PF: predicated region fallthrough
CT: control target
= control target key end

     0   :  { %v1817_v7 = vmov 0.0   ;;  %s2349_s0 = inlined_call_operand.vmem [shape: f32[16,64], index: 0, kind: input, shape index: {}]   ;;  %s2350_s1 = inlined_call_operand.vmem [shape: f32[64,256], index: 1, kind: input, shape index: {}]   ;;  %s2351_s2 = inlined_call_operand.vmem [shape: f32[1,256], index: 2, kind: input, shape index: {}]   ;;  %s2352_s3 = inlined_call_operand.vmem [shape: f32[64,256], index: 3, kind: input, shape index: {}]   ;;  %s2353_s4 = inlined_call_operand.vmem [shape: f32[64,192], index: 4, kind: input, shape index: {}]   ;;  %s2354_s5 = inlined_call_operand.vmem [shape: f32[1,192], index: 5, kind: input, shape index: {}]   ;;  %s2355_s6 = inlined_call_operand.vmem [shape: f32[192,84], index: 6, kind: input, shape index: {}]   ;;  %s2356_s7 = inlined_call_operand.vmem [shape: f32[1,84], index: 7, kind: input, shape index: {}]   ;;  %s2357_s8 = inlined_call_operand.vmem [shape: f32[84,5], index: 8, kind: input, shape index: {}]   ;;  %s2358_s9 = inlined_call_operand.vmem [shape: f32[1,5], index: 9, kind: input, shape index: {}]   ;;  %s2359_s10 = inlined_call_operand.hbm [shape: f32[2,5], index: 10, kind: output, shape index: {}]  }
   0x1   :  { %v39_v0 = vld [vmem:[%s2350_s1 + $0x8] sm:$0xff]  ;;  %v41_v1 = vld [vmem:[%s2350_s1 + $0x18] sm:$0xff]  ;;  %v38_v2 = vld [vmem:[%s2350_s1] sm:$0xff]  ;;  %137 = vmatprep.mubr.f32.mxu1 %v1817_v7  ;;  %340 = vmatprep.mubr.f32.mxu0 %v1817_v7 }
   0x2   :  { %v1481_v3 = vpack.c.bf16 %v41_v1, %v39_v0  ;;  %v40_v4 = vld [vmem:[%s2350_s1 + $0x10] sm:$0xff]  ;;  %v43_v5 = vld [vmem:[%s2350_s1 + $0x28] sm:$0xff]  ;;  %v45_v6 = vld [vmem:[%s2350_s1 + $0x38] sm:$0xff] }
   0x3   :  { %v1483_v8 = vpack.c.bf16 %v40_v4, %v38_v2  ;;  %v1485_v9 = vpack.c.bf16 %v45_v6, %v43_v5  ;;  %v42_v10 = vld [vmem:[%s2350_s1 + $0x20] sm:$0xff]  ;;  %v44_v11 = vld [vmem:[%s2350_s1 + $0x30] sm:$0xff]  ;;  %v47_v12 = vld [vmem:[%s2350_s1 + $0x48] sm:$0xff] }
   0x4   :  { %1482 = vmatprep.subr.bf16.mxu1 %v1481_v3  ;;  %v49_v13 = vld [vmem:[%s2350_s1 + $0x58] sm:$0xff]  ;;  %v1487_v14 = vpack.c.bf16 %v44_v11, %v42_v10  ;;  %v46_v15 = vld [vmem:[%s2350_s1 + $0x40] sm:$0xff]  ;;  %v48_v16 = vld [vmem:[%s2350_s1 + $0x50] sm:$0xff] }
   0x5   :  { %1484 = vmatpush1.bf16.msra.mxu1 %v1483_v8  ;;  %v1489_v17 = vpack.c.bf16 %v49_v13, %v47_v12  ;;  %v51_v18 = vld [vmem:[%s2350_s1 + $0x68] sm:$0xff]  ;;  %v53_v19 = vld [vmem:[%s2350_s1 + $0x78] sm:$0xff]  ;;  %v150_v22 = vld [vmem:[%s2352_s3] sm:$0xff]  ;;  %v1491_v27 = vpack.c.bf16 %v48_v16, %v46_v15 }
   0x6   :  { %1486 = vmatprep.subr.bf16.mxu1 %v1485_v9  ;;  %v151_v20 = vld [vmem:[%s2352_s3 + $0x8] sm:$0xff]  ;;  %v153_v21 = vld [vmem:[%s2352_s3 + $0x18] sm:$0xff]  ;;  %v152_v23 = vld [vmem:[%s2352_s3 + $0x10] sm:$0xff]  ;;  %v1493_v30 = vpack.c.bf16 %v53_v19, %v51_v18 }
   0x7   :  { %v1933_v24 = vpack.c.bf16 %v153_v21, %v151_v20  ;;  %v155_v25 = vld [vmem:[%s2352_s3 + $0x28] sm:$0xff]  ;;  %v157_v26 = vld [vmem:[%s2352_s3 + $0x38] sm:$0xff]  ;;  %v50_v28 = vld [vmem:[%s2350_s1 + $0x60] sm:$0xff]  ;;  %v1944_v29 = vpack.c.bf16 %v152_v23, %v150_v22 }
   0x8   :  { %v52_v31 = vld [vmem:[%s2350_s1 + $0x70] sm:$0xff]  ;;  %v1949_v32 = vpack.c.bf16 %v157_v26, %v155_v25  ;;  %v154_v33 = vld [vmem:[%s2352_s3 + $0x20] sm:$0xff]  ;;  %v159_v35 = vld [vmem:[%s2352_s3 + $0x48] sm:$0xff] }
   0x9   :  { %1488 = vmatpush1.bf16.msra.mxu1 %v1487_v14  ;;  %v156_v34 = vld [vmem:[%s2352_s3 + $0x30] sm:$0xff]  ;;  %1514 = vmatprep.subr.bf16.mxu0 %v1933_v24  ;;  %v161_v36 = vld [vmem:[%s2352_s3 + $0x58] sm:$0xff] }
   0xa   :  { %1490 = vmatprep.subr.bf16.mxu1 %v1489_v17  ;;  %1516 = vmatpush1.bf16.msra.mxu0 %v1944_v29 }
   0xb   :  { %1518 = vmatprep.subr.bf16.mxu0 %v1949_v32 }
   0xc   :  { %15 = vsyncpa [#allocation3], 0  ;;  %v1495_v37 = vpack.c.bf16 %v52_v31, %v50_v28  ;;  %v1966_v38 = vpack.c.bf16 %v156_v34, %v154_v33  ;;  %v1968_v39 = vpack.c.bf16 %v161_v36, %v159_v35  ;;  %v158_v40 = vld [vmem:[%s2352_s3 + $0x40] sm:$0xff]  ;;  %v160_v41 = vld [vmem:[%s2352_s3 + $0x50] sm:$0xff]  ;;  %vm66_vm0 = vcmask 523264  }
   0xd   :  { %1492 = vmatpush1.bf16.msra.mxu1 %v1491_v27  ;;  %v163_v42 = vld [vmem:[%s2352_s3 + $0x68] sm:$0xff]  ;;  %v165_v43 = vld [vmem:[%s2352_s3 + $0x78] sm:$0xff]  ;;  %v36_v44 = vld [vmem:[%s2349_s0] sm:$0xff]  ;;  %v1987_v45 = vpack.c.bf16 %v160_v41, %v158_v40  ;;  %v56_v51 = vlaneseq  ;;  %vm1323_vm1 = vcmask 1043456   ;;  %vm1820_vm2 = vmmov 0  }
   0xe   :  { %1494 = vmatprep.subr.bf16.mxu1 %v1493_v30  ;;  %1520 = vmatpush1.bf16.msra.mxu0 %v1966_v38  ;;  %v1990_v46 = vpack.c.bf16 %v165_v43, %v163_v42  ;;  %v162_v47 = vld [vmem:[%s2352_s3 + $0x60] sm:$0xff]  ;;  %v164_v48 = vld [vmem:[%s2352_s3 + $0x70] sm:$0xff]  ;;  %v37_v49 = vld [vmem:[%s2349_s0 + $0x8] sm:$0xff]  ;;  %vm1319_vm3 = vcmask 687104   ;;  %vm1397_vm4 = vcmask 33792  }
   0xf   :  { %1522 = vmatprep.subr.bf16.mxu0 %v1968_v39  ;;  %v2006_v50 = vpack.c.bf16 %v164_v48, %v162_v47  ;;  %v2029_v52 = vshrl.u32 %v56_v51, 7  ;;  %v54_v54 = vld [vmem:[%s2351_s2] sm:$0x3]  ;;  %s1818_s2 = smov 64  }
  0x11   :  { %1496 = vmatpush1.bf16.msra.mxu1 %v1495_v37  ;;  %v58_v53 = vsub.s32 0, %v2029_v52  ;;  %v62_v56 = vsub.s32 1, %v2029_v52  ;;  %v1311_v52 = vld [vmem:[%s2357_s8 + $0x50] sm:$0xf] }
  0x12   :  { %1498 = vmatprep.subr.bf16.mxu1 %v1933_v24  ;;  %1524 = vmatpush1.bf16.msra.mxu0 %v1987_v45 }
  0x13   :  { %1526 = vmatprep.subr.bf16.mxu0 %v1990_v46  ;;  %v59_v58 = vrot.slane %v54_v54, %v58_v53  ;;  %v63_v59 = vrot.slane %v54_v54, %v62_v56 }
  0x14   :  { %1413 = vmatmul.mubr.msk.f32.vlgmr.msra.gmra.mrb[0].mxu1 %vm66_vm0, %v36_v44 }
  0x15   :  { %1500 = vmatpush1.bf16.msra.mxu1 %v1944_v29  ;;  %143 = vmatprep.mubr.f32.mxu1 %v1817_v7 }
  0x16   :  { %1502 = vmatprep.subr.bf16.mxu1 %v1949_v32  ;;  %1528 = vmatpush1.bf16.msra.mxu0 %v2006_v50 }
  0x17   :  { %1546 = vmatprep.subr.bf16.mxu0 %v1933_v24 }
  0x18   :  { %1414 = vmatmul.mubr.msk.f32.gmra.mrb[2].mxu1 %vm66_vm0, %v37_v49 }
  0x19   :  { %1504 = vmatpush1.bf16.msra.mxu1 %v1966_v38  ;;  %233 = vmatprep.mubr.f32.mxu1 %v1817_v7 }
  0x1a   :  { %1506 = vmatprep.subr.bf16.mxu1 %v1968_v39 }
  0x1d   :  { %1508 = vmatpush1.bf16.msra.mxu1 %v1987_v45 }
  0x1e   :  { %1510 = vmatprep.subr.bf16.mxu1 %v1990_v46 }
  0x21   :  { %1512 = vmatpush1.bf16.msra.mxu1 %v2006_v50 }
  0x22   :  { %1530 = vmatprep.subr.bf16.mxu1 %v1933_v24 }
  0x24   :  { %234 = vmatmul.mubr.f32.vlgmr.msra.gmra.mrb[4].mxu1 %v1817_v7 }
  0x25   :  { %1532 = vmatpush1.bf16.msra.mxu1 %v1944_v29  ;;  %458 = vmatprep.mubr.f32.mxu1 %v1817_v7 }
  0x26   :  { %1534 = vmatprep.subr.bf16.mxu1 %v1949_v32 }
  0x29   :  { %1536 = vmatpush1.bf16.msra.mxu1 %v1966_v38 }
  0x2a   :  { %1538 = vmatprep.subr.bf16.mxu1 %v1968_v39 }
  0x2d   :  { %1540 = vmatpush1.bf16.msra.mxu1 %v1987_v45 }
  0x2e   :  { %1542 = vmatprep.subr.bf16.mxu1 %v1990_v46 }
  0x31   :  { %1544 = vmatpush1.bf16.msra.mxu1 %v2006_v50 }
  0x32   :  { %1562 = vmatprep.subr.bf16.mxu1 %v1933_v24 }
  0xe7   :  { %v139_v55 = vpop.f32.mrb[0].mxu1 }
  0xe8   :  { %v141_v57 = vpop.f32.mrb[1].mxu1  ;;  %v2048_v5 = vadd.f32 %v139_v55, %v59_v58 }
  0xe9   :  { %v2044_v0 = vadd.f32 %v141_v57, %v63_v59 }
  0xeb   :  { %v145_v60 = vpop.f32.mrb[2].mxu1 }
  0xec   :  { %v2040_v61 = vadd.f32 %v145_v60, %v59_v58  ;;  %v147_v62 = vpop.f32.mrb[3].mxu1 }
  0xed   :  { %v2042_v63 = vadd.f32 %v147_v62, %v63_v59 }
  0xf7   :  { %v235_v1 = vpop.f32.mrb[4].mxu1 }
  0xf8   :  { %v237_v2 = vpop.f32.mrb[5].mxu1  ;;  %v240_v6 = vadd.f32 %v235_v1, %v2048_v5 }
  0xf9   :  { %v241_v3 = vadd.f32 %v237_v2, %v2044_v0 }
  0xfa   :  { %v1415_v8 = vmul.f32 -1.442695, %v240_v6 }
  0xfb   :  { %1697 = vtanh.f32 %v241_v3  ;;  %v1416_v18 = vmul.f32 -1.442695, %v241_v3 }
  0xfc   :  { %1699 = vpow2.f32 %v1415_v8 }
 0x105   :  { %v1698_v4 = vpop.eup %1697 }
 0x106   :  { %257 = vrot.lane.b32.xlu0 %v1698_v4, %s1818_s2  ;;  %v1700_v9 = vpop.eup %1699 }
 0x107   :  { %v248_v10 = vadd.f32 1.0, %v1700_v9 }
 0x109   :  { %1701 = vrcp.f32 %v248_v10 }
 0x113   :  { %v1702_v11 = vpop.eup %1701 }
 0x114   :  { %v255_v14 = vmul.f32 0.0, %v1702_v11 }
 0x178   :  { %v258_v12 = vpop.permute.xlu0 %257 }
 0x179   :  { %v260_v13 = vmul.f32 %v1702_v11, %v258_v12 }
 0x17b   :  { %262 = vrot.lane.b32.xlu0 %v260_v13, %s1818_s2 }
 0x1ed   :  { %v263_v15 = vpop.permute.xlu0 %262 }
 0x1ee   :  { %v265_v16 = vadd.f32 %v263_v15, %v255_v14 }
 0x1f0   :  { %1703 = vtanh.f32 %v265_v16  ;;  %v369_v42 = vrot.slane %v265_v16, 6 }
 0x1f1   :  { %1705 = vpow2.f32 %v1416_v18 }
 0x1fa   :  { %v1704_v17 = vpop.eup %1703 }
 0x1fb   :  { %268 = vrot.lane.b32.xlu1 %v1704_v17, %s1818_s2  ;;  %v1706_v19 = vpop.eup %1705 }
 0x1fc   :  { %v249_v20 = vadd.f32 1.0, %v1706_v19 }
 0x1fe   :  { %1707 = vrcp.f32 %v249_v20 }
 0x208   :  { %v1708_v21 = vpop.eup %1707 }
 0x26d   :  { %v269_v22 = vpop.permute.xlu1 %268 }
 0x26e   :  { %v2053_v23 = vmul.f32 %v1708_v21, %v269_v22 }
 0x270   :  { %1417 = vmatmul.mubr.msk.f32.vlgmr.msra.gmra.mrb[0].mxu0 %vm66_vm0, %v2053_v23 }
 0x271   :  { %1548 = vmatpush1.bf16.msra.mxu0 %v1944_v29  ;;  %576 = vmatprep.mubr.f32.mxu0 %v1817_v7 }
 0x272   :  { %1550 = vmatprep.subr.bf16.mxu0 %v1949_v32 }
 0x275   :  { %1552 = vmatpush1.bf16.msra.mxu0 %v1966_v38 }
 0x276   :  { %1554 = vmatprep.subr.bf16.mxu0 %v1968_v39 }
 0x279   :  { %1556 = vmatpush1.bf16.msra.mxu0 %v1987_v45 }
 0x27a   :  { %1558 = vmatprep.subr.bf16.mxu0 %v1990_v46 }
 0x27d   :  { %1560 = vmatpush1.bf16.msra.mxu0 %v2006_v50 }
 0x27e   :  { %1578 = vmatprep.subr.bf16.mxu0 %v1933_v24 }
 0x343   :  { %v342_v25 = vpop.f32.mrb[0].mxu0 }
 0x344   :  { %v344_v26 = vpop.f32.mrb[1].mxu0  ;;  %v349_v31 = vrot.slane %v342_v25, 6 }
 0x345   :  { %v350_v27 = vrot.slane %v344_v26, 6 }
 0x346   :  { %v353_v33 = vadd.f32 %v349_v31, %v2048_v5 }
 0x347   :  { %v354_v28 = vadd.f32 %v350_v27, %v2044_v0 }
 0x348   :  { %v1418_v34 = vmul.f32 -1.442695, %v353_v33 }
 0x349   :  { %1709 = vtanh.f32 %v354_v28  ;;  %v1419_v49 = vmul.f32 -1.442695, %v354_v28 }
 0x34a   :  { %1711 = vpow2.f32 %v1418_v34 }
 0x353   :  { %v1710_v30 = vpop.eup %1709 }
 0x354   :  { %373 = vrot.lane.b32.xlu1 %v1710_v30, %s1818_s2  ;;  %v1712_v35 = vpop.eup %1711 }
 0x355   :  { %v361_v36 = vadd.f32 1.0, %v1712_v35 }
 0x357   :  { %1713 = vrcp.f32 %v361_v36 }
 0x361   :  { %v1714_v37 = vpop.eup %1713 }
 0x362   :  { %v371_v43 = vmul.f32 %v1714_v37, %v369_v42 }
 0x3c6   :  { %v374_v40 = vpop.permute.xlu1 %373 }
 0x3c7   :  { %v376_v41 = vmul.f32 %v1714_v37, %v374_v40 }
 0x3c9   :  { %378 = vrot.lane.b32.xlu0 %v376_v41, %s1818_s2 }
 0x43b   :  { %v379_v44 = vpop.permute.xlu0 %378 }
 0x43c   :  { %v381_v47 = vadd.f32 %v379_v44, %v371_v43 }
 0x43e   :  { %1715 = vtanh.f32 %v381_v47  ;;  %v487_v14 = vrot.slane %v381_v47, 6 }
 0x43f   :  { %1717 = vpow2.f32 %v1419_v49 }
 0x448   :  { %v1716_v48 = vpop.eup %1715 }
 0x449   :  { %384 = vrot.lane.b32.xlu1 %v1716_v48, %s1818_s2  ;;  %v1718_v51 = vpop.eup %1717 }
 0x44a   :  { %v362_v54 = vadd.f32 1.0, %v1718_v51 }
 0x44c   :  { %1719 = vrcp.f32 %v362_v54 }
 0x456   :  { %v1720_v55 = vpop.eup %1719 }
 0x4bb   :  { %v385_v57 = vpop.permute.xlu1 %384 }
 0x4bc   :  { %v387_v58 = vmul.f32 %v1720_v55, %v385_v57 }
 0x4be   :  { %v389_v59 = vrot.slane %v387_v58, 2 }
 0x4c0   :  { %1420 = vmatmul.mubr.msk.f32.vlgmr.msra.gmra.mrb[6].mxu1 %vm66_vm0, %v389_v59  ;;  %v391_v27 = vadd.f32 %v389_v59, %v2053_v23 }
 0x4c1   :  { %1564 = vmatpush1.bf16.msra.mxu1 %v1944_v29  ;;  %694 = vmatprep.mubr.f32.mxu1 %v1817_v7 }
 0x4c2   :  { %1566 = vmatprep.subr.bf16.mxu1 %v1949_v32 }
 0x4c5   :  { %1568 = vmatpush1.bf16.msra.mxu1 %v1966_v38 }
 0x4c6   :  { %1570 = vmatprep.subr.bf16.mxu1 %v1968_v39 }
 0x4c9   :  { %1572 = vmatpush1.bf16.msra.mxu1 %v1987_v45 }
 0x4ca   :  { %1574 = vmatprep.subr.bf16.mxu1 %v1990_v46 }
 0x4cd   :  { %1576 = vmatpush1.bf16.msra.mxu1 %v2006_v50 }
 0x4ce   :  { %1594 = vmatprep.subr.bf16.mxu1 %v1933_v24 }
 0x593   :  { %v460_v60 = vpop.f32.mrb[6].mxu1 }
 0x594   :  { %v462_v62 = vpop.f32.mrb[7].mxu1  ;;  %v467_v4 = vrot.slane %v460_v60, 4 }
 0x595   :  { %v468_v1 = vrot.slane %v462_v62, 4 }
 0x596   :  { %v471_v6 = vadd.f32 %v467_v4, %v2048_v5 }
 0x597   :  { %v472_v2 = vadd.f32 %v468_v1, %v2044_v0 }
 0x598   :  { %v1421_v8 = vmul.f32 -1.442695, %v471_v6 }
 0x599   :  { %1721 = vtanh.f32 %v472_v2  ;;  %v1422_v19 = vmul.f32 -1.442695, %v472_v2 }
 0x59a   :  { %1723 = vpow2.f32 %v1421_v8 }
 0x5a3   :  { %v1722_v3 = vpop.eup %1721 }
 0x5a4   :  { %491 = vrot.lane.b32.xlu0 %v1722_v3, %s1818_s2  ;;  %v1724_v9 = vpop.eup %1723 }
 0x5a5   :  { %v479_v10 = vadd.f32 1.0, %v1724_v9 }
 0x5a7   :  { %1725 = vrcp.f32 %v479_v10 }
 0x5b1   :  { %v1726_v11 = vpop.eup %1725 }
 0x5b2   :  { %v489_v15 = vmul.f32 %v1726_v11, %v487_v14 }
 0x616   :  { %v492_v12 = vpop.permute.xlu0 %491 }
 0x617   :  { %v494_v13 = vmul.f32 %v1726_v11, %v492_v12 }
 0x619   :  { %496 = vrot.lane.b32.xlu1 %v494_v13, %s1818_s2 }
 0x68b   :  { %v497_v16 = vpop.permute.xlu1 %496 }
 0x68c   :  { %v499_v17 = vadd.f32 %v497_v16, %v489_v15 }
 0x68e   :  { %1727 = vtanh.f32 %v499_v17  ;;  %v605_v47 = vrot.slane %v499_v17, 6 }
 0x68f   :  { %1729 = vpow2.f32 %v1422_v19 }
 0x698   :  { %v1728_v18 = vpop.eup %1727 }
 0x699   :  { %502 = vrot.lane.b32.xlu0 %v1728_v18, %s1818_s2  ;;  %v1730_v20 = vpop.eup %1729 }
 0x69a   :  { %v480_v21 = vadd.f32 1.0, %v1730_v20 }
 0x69c   :  { %1731 = vrcp.f32 %v480_v21 }
 0x6a6   :  { %v1732_v22 = vpop.eup %1731 }
 0x70b   :  { %v503_v25 = vpop.permute.xlu0 %502 }
 0x70c   :  { %v505_v26 = vmul.f32 %v1732_v22, %v503_v25 }
 0x70e   :  { %v507_v28 = vrot.slane %v505_v26, 4 }
 0x710   :  { %v509_v30 = vadd.f32 %v507_v28, %v391_v27  ;;  %1423 = vmatmul.mubr.msk.f32.vlgmr.msra.gmra.mrb[2].mxu0 %vm66_vm0, %v507_v28 }
 0x711   :  { %1580 = vmatpush1.bf16.msra.mxu0 %v1944_v29  ;;  %804 = vmatprep.mubr.f32.mxu0 %v1817_v7 }
 0x712   :  { %1582 = vmatprep.subr.bf16.mxu0 %v1949_v32 }
 0x715   :  { %1584 = vmatpush1.bf16.msra.mxu0 %v1966_v38 }
 0x716   :  { %1586 = vmatprep.subr.bf16.mxu0 %v1968_v39 }
 0x719   :  { %1588 = vmatpush1.bf16.msra.mxu0 %v1987_v45 }
 0x71a   :  { %1590 = vmatprep.subr.bf16.mxu0 %v1990_v46 }
 0x71d   :  { %1592 = vmatpush1.bf16.msra.mxu0 %v2006_v50 }
 0x71e   :  { %1610 = vmatprep.subr.bf16.mxu0 %v1933_v24 }
 0x7e3   :  { %v578_v23 = vpop.f32.mrb[2].mxu0 }
 0x7e4   :  { %v580_v31 = vpop.f32.mrb[3].mxu0  ;;  %v585_v36 = vrot.slane %v578_v23, 2 }
 0x7e5   :  { %v586_v33 = vrot.slane %v580_v31, 2 }
 0x7e6   :  { %v589_v37 = vadd.f32 %v585_v36, %v2048_v5 }
 0x7e7   :  { %v590_v34 = vadd.f32 %v586_v33, %v2044_v0 }
 0x7e8   :  { %v1424_v40 = vmul.f32 -1.442695, %v589_v37 }
 0x7e9   :  { %1733 = vtanh.f32 %v590_v34  ;;  %v1425_v54 = vmul.f32 -1.442695, %v590_v34 }
 0x7ea   :  { %1735 = vpow2.f32 %v1424_v40 }
 0x7f3   :  { %v1734_v35 = vpop.eup %1733 }
 0x7f4   :  { %609 = vrot.lane.b32.xlu1 %v1734_v35, %s1818_s2  ;;  %v1736_v41 = vpop.eup %1735 }
 0x7f5   :  { %v597_v42 = vadd.f32 1.0, %v1736_v41 }
 0x7f7   :  { %1737 = vrcp.f32 %v597_v42 }
 0x801   :  { %v1738_v43 = vpop.eup %1737 }
 0x802   :  { %v607_v48 = vmul.f32 %v1738_v43, %v605_v47 }
 0x866   :  { %v610_v44 = vpop.permute.xlu1 %609 }
 0x867   :  { %v612_v24 = vmul.f32 %v1738_v43, %v610_v44 }
 0x869   :  { %614 = vrot.lane.b32.xlu0 %v612_v24, %s1818_s2 }
 0x8db   :  { %v615_v0 = vpop.permute.xlu0 %614 }
 0x8dc   :  { %v617_v49 = vadd.f32 %v615_v0, %v607_v48 }
 0x8de   :  { %1739 = vtanh.f32 %v617_v49  ;;  %v717_v14 = vrot.slane %v617_v49, 6 }
 0x8df   :  { %1741 = vpow2.f32 %v1425_v54 }
 0x8e8   :  { %v1740_v51 = vpop.eup %1739 }
 0x8e9   :  { %620 = vrot.lane.b32.xlu1 %v1740_v51, %s1818_s2  ;;  %v1742_v5 = vpop.eup %1741 }
 0x8ea   :  { %v598_v55 = vadd.f32 1.0, %v1742_v5 }
 0x8ec   :  { %1743 = vrcp.f32 %v598_v55 }
 0x8f6   :  { %v1744_v57 = vpop.eup %1743 }
 0x95b   :  { %v621_v58 = vpop.permute.xlu1 %620 }
 0x95c   :  { %v623_v59 = vmul.f32 %v1744_v57, %v621_v58 }
 0x95e   :  { %v625_v60 = vrot.slane %v623_v59, 6 }
 0x960   :  { %v627_v62 = vadd.f32 %v625_v60, %v509_v30  ;;  %1426 = vmatmul.mubr.msk.f32.vlgmr.msra.gmra.mrb[8].mxu1 %vm66_vm0, %v625_v60 }
 0x961   :  { %1596 = vmatpush1.bf16.msra.mxu1 %v1944_v29  ;;  %922 = vmatprep.mubr.f32.mxu1 %v1817_v7 }
 0x962   :  { %1598 = vmatprep.subr.bf16.mxu1 %v1949_v32 }
 0x965   :  { %1600 = vmatpush1.bf16.msra.mxu1 %v1966_v38 }
 0x966   :  { %1602 = vmatprep.subr.bf16.mxu1 %v1968_v39 }
 0x969   :  { %1604 = vmatpush1.bf16.msra.mxu1 %v1987_v45 }
 0x96a   :  { %1606 = vmatprep.subr.bf16.mxu1 %v1990_v46 }
 0x96d   :  { %1608 = vmatpush1.bf16.msra.mxu1 %v2006_v50 }
 0xa33   :  { %v696_v1 = vpop.f32.mrb[8].mxu1 }
 0xa34   :  { %v698_v2 = vpop.f32.mrb[9].mxu1  ;;  %v701_v6 = vadd.f32 %v696_v1, %v2040_v61 }
 0xa35   :  { %v702_v3 = vadd.f32 %v698_v2, %v2042_v63 }
 0xa36   :  { %v1427_v8 = vmul.f32 -1.442695, %v701_v6 }
 0xa37   :  { %1745 = vtanh.f32 %v702_v3  ;;  %v1428_v19 = vmul.f32 -1.442695, %v702_v3 }
 0xa38   :  { %1747 = vpow2.f32 %v1427_v8 }
 0xa41   :  { %v1746_v4 = vpop.eup %1745 }
 0xa42   :  { %721 = vrot.lane.b32.xlu0 %v1746_v4, %s1818_s2  ;;  %v1748_v9 = vpop.eup %1747 }
 0xa43   :  { %v709_v10 = vadd.f32 1.0, %v1748_v9 }
 0xa45   :  { %1749 = vrcp.f32 %v709_v10 }
 0xa4f   :  { %v1750_v11 = vpop.eup %1749 }
 0xa50   :  { %v719_v15 = vmul.f32 %v1750_v11, %v717_v14 }
 0xab4   :  { %v722_v12 = vpop.permute.xlu0 %721 }
 0xab5   :  { %v724_v13 = vmul.f32 %v1750_v11, %v722_v12 }
 0xab7   :  { %726 = vrot.lane.b32.xlu1 %v724_v13, %s1818_s2 }
 0xb29   :  { %v727_v16 = vpop.permute.xlu1 %726 }
 0xb2a   :  { %v729_v17 = vadd.f32 %v727_v16, %v719_v15 }
 0xb2c   :  { %1751 = vtanh.f32 %v729_v17  ;;  %v833_v35 = vrot.slane %v729_v17, 6 }
 0xb2d   :  { %1753 = vpow2.f32 %v1428_v19 }
 0xb36   :  { %v1752_v18 = vpop.eup %1751 }
 0xb37   :  { %732 = vrot.lane.b32.xlu0 %v1752_v18, %s1818_s2  ;;  %v1754_v20 = vpop.eup %1753 }
 0xb38   :  { %v710_v21 = vadd.f32 1.0, %v1754_v20 }
 0xb3a   :  { %1755 = vrcp.f32 %v710_v21 }
 0xb44   :  { %v1756_v22 = vpop.eup %1755 }
 0xba9   :  { %v733_v25 = vpop.permute.xlu0 %732 }
 0xbaa   :  { %v735_v26 = vmul.f32 %v1756_v22, %v733_v25 }
 0xbac   :  { %v736_v27 = vadd.f32 %v735_v26, %v627_v62  ;;  %1429 = vmatmul.mubr.msk.f32.vlgmr.msra.gmra.mrb[4].mxu0 %vm66_vm0, %v735_v26 }
 0xbad   :  { %1612 = vmatpush1.bf16.msra.mxu0 %v1944_v29  ;;  %1040 = vmatprep.mubr.f32.mxu0 %v1817_v7 }
 0xbae   :  { %1614 = vmatprep.subr.bf16.mxu0 %v1949_v32 }
 0xbb1   :  { %1616 = vmatpush1.bf16.msra.mxu0 %v1966_v38 }
 0xbb2   :  { %1618 = vmatprep.subr.bf16.mxu0 %v1968_v39 }
 0xbb5   :  { %1620 = vmatpush1.bf16.msra.mxu0 %v1987_v45 }
 0xbb6   :  { %1622 = vmatprep.subr.bf16.mxu0 %v1990_v46 }
 0xbb9   :  { %1624 = vmatpush1.bf16.msra.mxu0 %v2006_v50 }
 0xc7f   :  { %v806_v28 = vpop.f32.mrb[4].mxu0 }
 0xc80   :  { %v808_v30 = vpop.f32.mrb[5].mxu0  ;;  %v813_v32 = vrot.slane %v806_v28, 6 }
 0xc81   :  { %v814_v23 = vrot.slane %v808_v30, 6 }
 0xc82   :  { %v817_v38 = vadd.f32 %v813_v32, %v2040_v61 }
 0xc83   :  { %v818_v31 = vadd.f32 %v814_v23, %v2042_v63 }
 0xc84   :  { %v1430_v33 = vmul.f32 -1.442695, %v817_v38 }
 0xc85   :  { %1757 = vtanh.f32 %v818_v31  ;;  %v1431_v42 = vmul.f32 -1.442695, %v818_v31 }
 0xc86   :  { %1759 = vpow2.f32 %v1430_v33  ;;  %v1095_v33 = vld [vmem:[%s2353_s4 + $0x18] sm:$0xff] }
 0xc8f   :  { %v1758_v29 = vpop.eup %1757 }
 0xc90   :  { %837 = vrot.lane.b32.xlu1 %v1758_v29, %s1818_s2  ;;  %v1760_v39 = vpop.eup %1759 }
 0xc91   :  { %v825_v45 = vadd.f32 1.0, %v1760_v39 }
 0xc93   :  { %1761 = vrcp.f32 %v825_v45  ;;  %v1094_v45 = vld [vmem:[%s2353_s4 + $0x10] sm:$0xff] }
 0xc9d   :  { %v1762_v46 = vpop.eup %1761 }
 0xc9e   :  { %v835_v36 = vmul.f32 %v1762_v46, %v833_v35 }
 0xd02   :  { %v838_v34 = vpop.permute.xlu1 %837 }
 0xd03   :  { %v840_v50 = vmul.f32 %v1762_v46, %v838_v34  ;;  %v1097_v46 = vld [vmem:[%s2353_s4 + $0x28] sm:$0xff]  ;;  %v1099_v34 = vld [vmem:[%s2353_s4 + $0x38] sm:$0xff] }
 0xd04   :  { %v1629_v35 = vpack.c.bf16 %v1099_v34, %v1097_v46 }
 0xd05   :  { %842 = vrot.lane.b32.xlu0 %v840_v50, %s1818_s2 }
 0xd77   :  { %v843_v37 = vpop.permute.xlu0 %842 }
 0xd78   :  { %v845_v40 = vadd.f32 %v843_v37, %v835_v36  ;;  %v1096_v36 = vld [vmem:[%s2353_s4 + $0x20] sm:$0xff]  ;;  %v1098_v37 = vld [vmem:[%s2353_s4 + $0x30] sm:$0xff] }
 0xd7a   :  { %1763 = vtanh.f32 %v845_v40  ;;  %v951_v6 = vrot.slane %v845_v40, 6  ;;  %v1101_v40 = vld [vmem:[%s2353_s4 + $0x48] sm:$0xff] }
 0xd7b   :  { %1765 = vpow2.f32 %v1431_v42  ;;  %v1631_v42 = vpack.c.bf16 %v1098_v37, %v1096_v36  ;;  %v1216_v37 = vld [vmem:[%s2355_s6 + $0xa0] sm:$0xff] }
 0xd84   :  { %v1764_v41 = vpop.eup %1763 }
 0xd85   :  { %848 = vrot.lane.b32.xlu1 %v1764_v41, %s1818_s2  ;;  %v1766_v43 = vpop.eup %1765  ;;  %v1103_v41 = vld [vmem:[%s2353_s4 + $0x58] sm:$0xff] }
 0xd86   :  { %v826_v44 = vadd.f32 1.0, %v1766_v43  ;;  %v1633_v43 = vpack.c.bf16 %v1103_v41, %v1101_v40  ;;  %v1218_v41 = vld [vmem:[%s2355_s6 + $0xb0] sm:$0xff] }
 0xd88   :  { %1767 = vrcp.f32 %v826_v44  ;;  %v1100_v44 = vld [vmem:[%s2353_s4 + $0x40] sm:$0xff] }
 0xd92   :  { %v1768_v24 = vpop.eup %1767 }
 0xdf7   :  { %v849_v47 = vpop.permute.xlu1 %848 }
 0xdf8   :  { %v851_v48 = vmul.f32 %v1768_v24, %v849_v47  ;;  %v1102_v24 = vld [vmem:[%s2353_s4 + $0x50] sm:$0xff] }
 0xdf9   :  { %v1635_v47 = vpack.c.bf16 %v1102_v24, %v1100_v44  ;;  %v1302_v44 = vld [vmem:[%s2357_s8 + $0x8] sm:$0xff]  ;;  %v1303_v24 = vld [vmem:[%s2357_s8 + $0x10] sm:$0xff] }
 0xdfa   :  { %v853_v0 = vrot.slane %v851_v48, 2 }
 0xdfc   :  { %v855_v49 = vadd.f32 %v853_v0, %v736_v27  ;;  %1432 = vmatmul.mubr.msk.f32.vlgmr.msra.gmra.mrb[10].mxu1 %vm66_vm0, %v853_v0 }
 0xdfd   :  { %1187 = vmatprep.mubr.f32.mxu1 %v1817_v7 }
 0xecf   :  { %v924_v51 = vpop.f32.mrb[10].mxu1 }
 0xed0   :  { %v926_v54 = vpop.f32.mrb[11].mxu1  ;;  %v931_v58 = vrot.slane %v924_v51, 4  ;;  %v1105_v51 = vld [vmem:[%s2353_s4 + $0x68] sm:$0xff] }
 0xed1   :  { %v932_v5 = vrot.slane %v926_v54, 4  ;;  %v1107_v54 = vld [vmem:[%s2353_s4 + $0x78] sm:$0xff] }
 0xed2   :  { %v935_v59 = vadd.f32 %v931_v58, %v2040_v61  ;;  %v1106_v58 = vld [vmem:[%s2353_s4 + $0x70] sm:$0xff] }
 0xed3   :  { %v936_v55 = vadd.f32 %v932_v5, %v2042_v63 }
 0xed4   :  { %v1433_v60 = vmul.f32 -1.442695, %v935_v59 }
 0xed5   :  { %1769 = vtanh.f32 %v936_v55  ;;  %v1434_v12 = vmul.f32 -1.442695, %v936_v55  ;;  %v1637_v55 = vpack.c.bf16 %v1107_v54, %v1105_v51  ;;  %v1306_v51 = vld [vmem:[%s2357_s8 + $0x28] sm:$0xff] }
 0xed6   :  { %1771 = vpow2.f32 %v1433_v60  ;;  %v1196_v60 = vld [vmem:[%s2355_s6] sm:$0xff] }
 0xedf   :  { %v1770_v57 = vpop.eup %1769 }
 0xee0   :  { %955 = vrot.lane.b32.xlu0 %v1770_v57, %s1818_s2  ;;  %v1772_v62 = vpop.eup %1771  ;;  %v1104_v57 = vld [vmem:[%s2353_s4 + $0x60] sm:$0xff] }
 0xee1   :  { %v943_v1 = vadd.f32 1.0, %v1772_v62  ;;  %v1639_v59 = vpack.c.bf16 %v1106_v58, %v1104_v57  ;;  %v1197_v62 = vld [vmem:[%s2355_s6 + $0x8] sm:$0xff]  ;;  %v1108_v58 = vld [vmem:[%s2354_s5] sm:$0x3] }
 0xee3   :  { %1773 = vrcp.f32 %v943_v1  ;;  %v1198_v1 = vld [vmem:[%s2355_s6 + $0x10] sm:$0xff] }
 0xeed   :  { %v1774_v2 = vpop.eup %1773 }
 0xeee   :  { %v953_v8 = vmul.f32 %v1774_v2, %v951_v6 }
 0xf52   :  { %v956_v3 = vpop.permute.xlu0 %955 }
 0xf53   :  { %v958_v4 = vmul.f32 %v1774_v2, %v956_v3  ;;  %v1819_v2 = vmov 0.0|0.0   ;;  %v1642_v3 = vpack.c.bf16 %v1197_v62, %v1196_v60  ;;  %v1117_v60 = vrot.slane %v1108_v58, %v62_v56  ;;  %v1439_v56 = vld [vmem:[%s2356_s7] ss:$0 sm:$0xff] }
 0xf54   :  { %1641 = vmatprep.subr.bf16.mxu0 %v1819_v2 }
 0xf55   :  { %960 = vrot.lane.b32.xlu1 %v958_v4, %s1818_s2  ;;  %v1199_v4 = vld [vmem:[%s2355_s6 + $0x18] sm:$0xff] }
 0xf56   :  { %v1645_v6 = vpack.c.bf16 %v1199_v4, %v1198_v1 }
 0xfc7   :  { %v961_v9 = vpop.permute.xlu1 %960 }
 0xfc8   :  { %v963_v10 = vadd.f32 %v961_v9, %v953_v8  ;;  %v1200_v8 = vld [vmem:[%s2355_s6 + $0x20] sm:$0xff]  ;;  %v1201_v9 = vld [vmem:[%s2355_s6 + $0x28] sm:$0xff] }
 0xfca   :  { %1775 = vtanh.f32 %v963_v10  ;;  %v1069_v48 = vrot.slane %v963_v10, 6 }
 0xfcb   :  { %1777 = vpow2.f32 %v1434_v12  ;;  %v1202_v12 = vld [vmem:[%s2355_s6 + $0x30] sm:$0xff] }
 0xfd4   :  { %v1776_v11 = vpop.eup %1775 }
 0xfd5   :  { %966 = vrot.lane.b32.xlu0 %v1776_v11, %s1818_s2  ;;  %v1778_v13 = vpop.eup %1777  ;;  %v1648_v11 = vpack.c.bf16 %v1201_v9, %v1200_v8 }
 0xfd6   :  { %v944_v14 = vadd.f32 1.0, %v1778_v13  ;;  %v1203_v13 = vld [vmem:[%s2355_s6 + $0x38] sm:$0xff] }
 0xfd8   :  { %1779 = vrcp.f32 %v944_v14  ;;  %v1651_v14 = vpack.c.bf16 %v1203_v13, %v1202_v12 }
 0xfe2   :  { %v1780_v15 = vpop.eup %1779 }
0x1047   :  { %v967_v16 = vpop.permute.xlu0 %966 }
0x1048   :  { %v969_v17 = vmul.f32 %v1780_v15, %v967_v16  ;;  %v1204_v15 = vld [vmem:[%s2355_s6 + $0x40] sm:$0xff]  ;;  %v1205_v16 = vld [vmem:[%s2355_s6 + $0x48] sm:$0xff] }
0x104a   :  { %v971_v18 = vrot.slane %v969_v17, 4  ;;  %v1654_v17 = vpack.c.bf16 %v1205_v16, %v1204_v15 }
0x104c   :  { %v2137_v19 = vadd.f32 %v971_v18, %v855_v49  ;;  %1435 = vmatmul.mubr.msk.f32.vlgmr.msra.gmra.mrb[6].mxu0 %vm66_vm0, %v971_v18  ;;  %v1206_v18 = vld [vmem:[%s2355_s6 + $0x50] sm:$0xff] }
0x104d   :  { %1643 = vmatpush1.bf16.msra.mxu0 %v1642_v3 }
0x104e   :  { %1644 = vmatprep.subr.bf16.mxu0 %v1819_v2 }
0x1051   :  { %1646 = vmatpush1.bf16.msra.mxu0 %v1645_v6 }
0x1052   :  { %1647 = vmatprep.subr.bf16.mxu0 %v1819_v2 }
0x1055   :  { %1649 = vmatpush1.bf16.msra.mxu0 %v1648_v11 }
0x1056   :  { %1650 = vmatprep.subr.bf16.mxu0 %v1819_v2 }
0x1059   :  { %1652 = vmatpush1.bf16.msra.mxu0 %v1651_v14  ;;  %v1441_v14 = vld [vmem:[%s2358_s9] ss:$0 sm:$0xff] }
0x105a   :  { %1653 = vmatprep.subr.bf16.mxu0 %v1819_v2 }
0x105d   :  { %1655 = vmatpush1.bf16.msra.mxu0 %v1654_v17 }
0x105e   :  { %1656 = vmatprep.subr.bf16.mxu0 %v1819_v2 }
0x111f   :  { %v1042_v20 = vpop.f32.mrb[6].mxu0 }
0x1120   :  { %v1044_v21 = vpop.f32.mrb[7].mxu0  ;;  %v1049_v27 = vrot.slane %v1042_v20, 2  ;;  %v1207_v20 = vld [vmem:[%s2355_s6 + $0x58] sm:$0xff] }
0x1121   :  { %v1050_v22 = vrot.slane %v1044_v21, 2  ;;  %v1657_v21 = vpack.c.bf16 %v1207_v20, %v1206_v18 }
0x1122   :  { %v1053_v28 = vadd.f32 %v1049_v27, %v2040_v61  ;;  %v1092_v61 = vld [vmem:[%s2353_s4] sm:$0xff] }
0x1123   :  { %v2141_v25 = vadd.f32 %v1050_v22, %v2042_v63  ;;  %v1093_v63 = vld [vmem:[%s2353_s4 + $0x8] sm:$0xff]  ;;  %v1627_v50 = vpack.c.bf16 %v1094_v45, %v1092_v61  ;;  %v1208_v22 = vld [vmem:[%s2355_s6 + $0x60] sm:$0xff]  ;;  %1658 = vmatpush1.bf16.msra.mxu0 %v1657_v21 }
0x1124   :  { %v1436_v30 = vmul.f32 -1.442695, %v1053_v28  ;;  %v1625_v39 = vpack.c.bf16 %v1095_v33, %v1093_v63  ;;  %1659 = vmatprep.subr.bf16.mxu0 %v1819_v2  ;;  %v1210_v28 = vld [vmem:[%s2355_s6 + $0x70] sm:$0xff]  ;;  %v1215_v63 = vld [vmem:[%s2355_s6 + $0x98] sm:$0xff] }
0x1125   :  { %1781 = vtanh.f32 %v2141_v25  ;;  %v1437_v61 = vmul.f32 -1.442695, %v2141_v25  ;;  %v1217_v25 = vld [vmem:[%s2355_s6 + $0xa8] sm:$0xff] }
0x1126   :  { %1783 = vpow2.f32 %v1436_v30  ;;  %1626 = vmatprep.subr.bf16.mxu1 %v1625_v39  ;;  %v1211_v30 = vld [vmem:[%s2355_s6 + $0x78] sm:$0xff]  ;;  %v1672_v40 = vpack.c.bf16 %v1217_v25, %v1216_v37 }
0x1127   :  { %1628 = vmatpush1.bf16.msra.mxu1 %v1627_v50 }
0x1128   :  { %1630 = vmatprep.subr.bf16.mxu1 %v1629_v35 }
0x112b   :  { %1632 = vmatpush1.bf16.msra.mxu1 %v1631_v42 }
0x112c   :  { %1634 = vmatprep.subr.bf16.mxu1 %v1633_v43  ;;  %v1301_v43 = vld [vmem:[%s2357_s8] sm:$0xff] }
0x112f   :  { %v1782_v26 = vpop.eup %1781  ;;  %1636 = vmatpush1.bf16.msra.mxu1 %v1635_v47  ;;  %v1678_v47 = vpack.c.bf16 %v1302_v44, %v1301_v43 }
0x1130   :  { %1073 = vrot.lane.b32.xlu1 %v1782_v26, %s1818_s2  ;;  %v1784_v23 = vpop.eup %1783  ;;  %1638 = vmatprep.subr.bf16.mxu1 %v1637_v55  ;;  %v1209_v26 = vld [vmem:[%s2355_s6 + $0x68] sm:$0xff]  ;;  %v1308_v55 = vld [vmem:[%s2357_s8 + $0x38] sm:$0xff] }
0x1131   :  { %v1061_v31 = vadd.f32 1.0, %v1784_v23  ;;  %v1660_v27 = vpack.c.bf16 %v1209_v26, %v1208_v22  ;;  %v1663_v23 = vpack.c.bf16 %v1211_v30, %v1210_v28 }
0x1133   :  { %1785 = vrcp.f32 %v1061_v31  ;;  %1640 = vmatpush1.bf16.msra.mxu1 %v1639_v59  ;;  %1661 = vmatpush1.bf16.msra.mxu0 %v1660_v27  ;;  %v1212_v31 = vld [vmem:[%s2355_s6 + $0x80] sm:$0xff]  ;;  %v1113_v59 = vrot.slane %v1108_v58, %v58_v53  ;;  %v1310_v53 = vld [vmem:[%s2357_s8 + $0x48] sm:$0xff] }
0x1134   :  { %1677 = vmatprep.subr.bf16.mxu1 %v1819_v2  ;;  %1662 = vmatprep.subr.bf16.mxu0 %v1819_v2 }
0x1137   :  { %1664 = vmatpush1.bf16.msra.mxu0 %v1663_v23 }
0x1138   :  { %1665 = vmatprep.subr.bf16.mxu0 %v1819_v2 }
0x113d   :  { %v1786_v29 = vpop.eup %1785 }
0x113e   :  { %v1071_v0 = vmul.f32 %v1786_v29, %v1069_v48  ;;  %v1304_v48 = vld [vmem:[%s2357_s8 + $0x18] sm:$0xff] }
0x11a2   :  { %v1074_v32 = vpop.permute.xlu1 %1073 }
0x11a3   :  { %v1076_v38 = vmul.f32 %v1786_v29, %v1074_v32  ;;  %v1213_v29 = vld [vmem:[%s2355_s6 + $0x88] sm:$0xff] }
0x11a4   :  { %v1666_v32 = vpack.c.bf16 %v1213_v29, %v1212_v31 }
0x11a5   :  { %1078 = vrot.lane.b32.xlu0 %v1076_v38, %s1818_s2  ;;  %v1214_v38 = vld [vmem:[%s2355_s6 + $0x90] sm:$0xff] }
0x11a6   :  { %1667 = vmatpush1.bf16.msra.mxu0 %v1666_v32  ;;  %v1669_v33 = vpack.c.bf16 %v1215_v63, %v1214_v38 }
0x11a7   :  { %1668 = vmatprep.subr.bf16.mxu0 %v1819_v2 }
0x11aa   :  { %1670 = vmatpush1.bf16.msra.mxu0 %v1669_v33 }
0x11ab   :  { %1671 = vmatprep.subr.bf16.mxu0 %v1819_v2 }
0x11ae   :  { %1673 = vmatpush1.bf16.msra.mxu0 %v1672_v40 }
0x11af   :  { %1674 = vmatprep.subr.bf16.mxu0 %v1819_v2 }
0x1217   :  { %v1079_v49 = vpop.permute.xlu0 %1078 }
0x1218   :  { %v1081_v5 = vadd.f32 %v1079_v49, %v1071_v0  ;;  %v1681_v0 = vpack.c.bf16 %v1304_v48, %v1303_v24  ;;  %v1305_v49 = vld [vmem:[%s2357_s8 + $0x20] sm:$0xff] }
0x1219   :  { %v1684_v54 = vpack.c.bf16 %v1306_v51, %v1305_v49 }
0x121a   :  { %1787 = vtanh.f32 %v1081_v5  ;;  %v1307_v5 = vld [vmem:[%s2357_s8 + $0x30] sm:$0xff] }
0x121b   :  { %1789 = vpow2.f32 %v1437_v61  ;;  %v1687_v57 = vpack.c.bf16 %v1308_v55, %v1307_v5 }
0x1224   :  { %v1788_v10 = vpop.eup %1787 }
0x1225   :  { %1084 = vrot.lane.b32.xlu1 %v1788_v10, %s1818_s2  ;;  %v1790_v39 = vpop.eup %1789 }
0x1226   :  { %v1062_v45 = vadd.f32 1.0, %v1790_v39 }
0x1228   :  { %1791 = vrcp.f32 %v1062_v45 }
0x1232   :  { %v1792_v46 = vpop.eup %1791 }
0x1297   :  { %v1085_v34 = vpop.permute.xlu1 %1084 }
0x1298   :  { %v1087_v50 = vmul.f32 %v1792_v46, %v1085_v34 }
0x129a   :  { %v1089_v35 = vrot.slane %v1087_v50, 6 }
0x129c   :  { %v1091_v36 = vadd.f32 %v1089_v35, %v2137_v19  ;;  %v1219_v19 = vld [vmem:[%s2355_s6 + $0xb8] sm:$0xff] }
0x129d   :  { %v1675_v42 = vpack.c.bf16 %v1219_v19, %v1218_v41 }
0x129e   :  { %1438 = vmatmul.mubr.msk.f32.vlgmr.msra.gmra.mrb[12].mxu1 %vm66_vm0, %v1091_v36 }
0x129f   :  { %1676 = vmatpush1.bf16.msra.mxu0 %v1675_v42  ;;  %1679 = vmatpush3.bf16.msra.mxu1 %v1678_v47 }
0x12a0   :  { %1680 = vmatprep.subr.bf16.mxu1 %v1819_v2  ;;  %1478 = vmatprep.mubr.msk.f32.mxu1 %vm1820_vm2, %v1817_v7 }
0x12a3   :  { %1682 = vmatpush3.bf16.msra.mxu1 %v1681_v0 }
0x12a4   :  { %1683 = vmatprep.subr.bf16.mxu1 %v1819_v2 }
0x12a7   :  { %1685 = vmatpush3.bf16.msra.mxu1 %v1684_v54 }
0x12a8   :  { %1686 = vmatprep.subr.bf16.mxu1 %v1819_v2 }
0x12ab   :  { %1688 = vmatpush3.bf16.msra.mxu1 %v1687_v57 }
0x12ac   :  { %1689 = vmatprep.subr.bf16.mxu1 %v1819_v2  ;;  %v1309_v2 = vld [vmem:[%s2357_s8 + $0x40] sm:$0xff]  ;;  %s1821_s8 = smov [#allocation2]  }
0x12ad   :  { %v1690_v9 = vpack.c.bf16 %v1310_v53, %v1309_v2  ;;  %s1405_s27 = sshll.u32 %s1821_s8, 4  ;;  %s1406_s27 = int_to_ptr.vmem [resolvable:$true] %s1405_s27 }
0x12ae   :  { %s1793_s28 = scalar_lea.vmem %s1406_s27, 32  ;;  %p1798_p1 = scmp.lt.s32.totalorder %s1406_s27, %s1406_s27 }
0x12af   :  { %1691 = vmatpush3.bf16.msra.mxu1 %v1690_v9  ;;  %p1794_p0 = scmp.ne.s32.totalorder %s1406_s27, %s1793_s28  ;;  %p1799_p2 = scmp.lt.s32.totalorder %s1793_s28, %s1793_s28 }
0x12b0   :  { %1476 = vmatprep.subr.mxu1 %v1817_v7 }
0x12b1   :  { %p1800_p3 = por %p1799_p2, %p1798_p1 }
0x12b3   :  { %1477 = vmatpush3.msk.msra.mxu1 %vm1323_vm1, %v1311_v52  ;;  %p1801_p4 = pnand %p1800_p3, %p1794_p0 }
0x1371   :  { %v1189_v62 = vpop.f32.mrb[12].mxu1 }
0x1372   :  { %v1190_v1 = vadd.f32 %v1189_v62, %v1113_v59  ;;  %v1191_v3 = vpop.f32.mrb[13].mxu1 }
0x1373   :  { %v1192_v4 = vadd.f32 %v1191_v3, %v1117_v60 }
0x1374   :  { %v1194_v8 = vmax.f32 %v1190_v1, 0.0 }
0x1375   :  { %v1195_v6 = vmax.f32 %v1192_v4, 0.0 }
0x1377   :  { %1440 = vmatprep.mubr.msk.f32.mxu0 %vm66_vm0, %v1195_v6 }
0x1378   :  { %1295 = vmatmul.mubr.f32.vlgmr.msra.gmra.mrb[8].mxu0 %v1194_v8 }
0x144b   :  { %v1296_v10 = vpop.f32.mrb[8].mxu0 }
0x144c   :  { %v1297_v11 = vadd.f32 %v1439_v56, %v1296_v10  ;;  %v1298_v12 = vpop.f32.mrb[9].mxu0 }
0x144e   :  { %v1300_v13 = vmax.f32 %v1297_v11, 0.0 }
0x1450   :  { %1479 = vmatmul.mubr.msk.f32.vlgmr.msra.gmra.mrb[14].mxu1 %vm1319_vm3, %v1300_v13 }
0x1523   :  { %v1393_v15 = vpop.f32.mrb[14].mxu1 }
0x1524   :  { %v1394_v16 = vadd.f32 %v1441_v14, %v1393_v15  ;;  %v1480_v7 = vpop.f32.mrb[15].mxu1 }
0x1526   :  { %1398 = vst.msk [vmem:[#allocation2] sm:$0x3] %vm1397_vm4, %v1394_v16 }
0x1527   :  { %1804 = shalt.err (!%p1801_p4)
}
0x1528   :  { %s1805_s30 = scalar_lea.hbm %s2359_s10, 32 }
0x1529   :  { %p1806_p5 = scmp.ne.s32.totalorder %s2359_s10, %s1805_s30  ;;  %p1809_p6 = scmp.lt.u32.totalorder %s1805_s30, %s2359_s10 }
0x152b   :  { %p1811_p7 = pnand %p1809_p6, %p1806_p5 }
0x152d   :  { %1814 = shalt.err (!%p1811_p7)
}
0x152e   :  { %1408 = dma.vmem_to_hbm [thread:$0]  %s1406_s27, 32, %s2359_s10, [#allocation3]  }
0x152f   :  { %1815 = dma.done.wait [#allocation3], 32  }
0x1530   :  { %1816 = vsyncadd [#allocation3], 4294967264 }
0x1531   :  { %1412 = vsyncpa [#allocation3], 1 }

</bundles_post_ra>
